<compile_context>
chip_gen: v7x
topology: tpu7x:2x2x1
jax: 0.10.0
libtpu: 0.0.40
codegen_flags: <defaults>
</compile_context>

<pallas_src>
import functools

import jax
import jax.numpy as jnp
from jax.experimental import pallas as pl
from jax.experimental.pallas import tpu as pltpu


_LANE = 128
_DEFAULT_VMEM_CAP = 64 * 1024 * 1024  # conservative fallback (v7x per-TC VMEM)

# Small-input fallback thresholds.
_MIN_PALLAS_BYTES = 1 << 20   # 1 MiB of concatenated output
_MIN_PALLAS_WIDTH = 256       # concatenated feature width (lanes)

# Per-tile VMEM policy.
_TILE_FOOTPRINT_CAP = 8 * 1024 * 1024   # double-buffered footprint budget
_MAX_TILE_ROWS = 1024
_MIN_GRID_STEPS = 8                      # pipelining + v7x megacore sharding
_VMEM_LIMIT_CAP = 48 * 1024 * 1024       # safe on 64 MiB per-TC VMEM (v7x)


def _round_up(x: int, mult: int) -> int:
    return -(-x // mult) * mult


def _vmem_capacity_bytes() -> int:
    """Per-core VMEM capacity, with a conservative fallback."""
    try:
        info = pltpu.get_tpu_info()
        cap = getattr(info, "vmem_capacity_bytes", None)
        if cap:
            return int(cap)
    except Exception:
        pass
    return _DEFAULT_VMEM_CAP


def _sublane_pack(dtype) -> int:
    """Rows per packed vreg sublane group for this dtype."""
    itemsize = jnp.dtype(dtype).itemsize
    if itemsize >= 4:
        return 8
    if itemsize == 2:
        return 16
    return 32


def _padded_bytes_per_row(m: int, n: int, dtype) -> int:
    """Double-buffered VMEM bytes per tile row, 128-lane padded, including the
    in-register concatenate temp used on the unaligned-split path."""
    itemsize = jnp.dtype(dtype).itemsize
    m_pad = _round_up(m, _LANE)
    n_pad = _round_up(n, _LANE)
    mn_pad = _round_up(m + n, _LANE)
    per_row = 2 * (m_pad + n_pad + mn_pad) * itemsize  # 2x buffered in+in+out
    if m % _LANE != 0:
        per_row += mn_pad * itemsize  # full (tr, m+n) concat temp
    return per_row


def _select_row_tile(rows: int, m: int, n: int, dtype) -> int:
    """Row tile: pack-aligned, small footprint, and grid >= ~8 when possible."""
    pack = _sublane_pack(dtype)
    bytes_per_row = _padded_bytes_per_row(m, n, dtype)
    vmem_cap = _vmem_capacity_bytes()

    budget = min(_TILE_FOOTPRINT_CAP, vmem_cap // 4)
    tr = (budget // bytes_per_row) // pack * pack
    tr = max(tr, pack)
    tr = min(tr, _MAX_TILE_ROWS)

    # Keep enough grid steps for double-buffer overlap and for sharding the
    # row axis across both v7x TensorCores.
    tr_for_grid = max(pack, ((rows // _MIN_GRID_STEPS) // pack) * pack)
    tr = min(tr, tr_for_grid)

    rows_padded = _round_up(rows, pack)
    tr = min(tr, rows_padded)
    return max(tr, pack)


def _vmem_limit_bytes(tr: int, m: int, n: int, dtype) -> int:
    needed = tr * _padded_bytes_per_row(m, n, dtype)
    # Hard cap well below per-TC VMEM on every generation; leaves headroom
    # for Mosaic internal scratch.
    return int(min(_VMEM_LIMIT_CAP, max(needed + (8 << 20), 32 << 20)))


def _concat_last_kernel(h_ref, hprev_ref, out_ref, *, m: int):
    if m % _LANE == 0:
        # Split point is vreg-lane aligned: two dense, unshifted stores.
        out_ref[:, :m] = h_ref[...]
        out_ref[:, m:] = hprev_ref[...]
    else:
        # Unaligned split: assemble the full (tr, m+n) tile in registers and
        # write it with a single lane-dense full-block store.
        out_ref[...] = jnp.concatenate([h_ref[...], hprev_ref[...]], axis=-1)


def _concat_last_dim(h: jax.Array, h_prev: jax.Array, *,
                     _force_pallas: bool = False) -> jax.Array:
    """Concatenate two arrays along the last axis with a Pallas TPU kernel."""
    assert h.shape[:-1] == h_prev.shape[:-1], "leading dims must match"
    assert h.dtype == h_prev.dtype, "dtypes must match"

    lead_shape = h.shape[:-1]
    m = h.shape[-1]
    n = h_prev.shape[-1]
    rows = 1
    for d in lead_shape:
        rows *= d

    if rows == 0 or m == 0 or n == 0:
        return jnp.concatenate([h, h_prev], axis=-1)

    itemsize = jnp.dtype(h.dtype).itemsize
    total_out_bytes = rows * (m + n) * itemsize
    if not _force_pallas and (
        total_out_bytes < _MIN_PALLAS_BYTES or (m + n) < _MIN_PALLAS_WIDTH
    ):
        # Tiny shapes: pallas_call launch + per-grid-step overhead dominates
        # and sub-128-lane output blocks store via masked vst; XLA's fused
        # concat is already at roofline here.
        return jnp.concatenate([h, h_prev], axis=-1)

    h2 = h.reshape(rows, m)
    p2 = h_prev.reshape(rows, n)

    tr = _select_row_tile(rows, m, n, h.dtype)
    grid = (pl.cdiv(rows, tr),)  # partial edge block is masked by Pallas

    out = pl.pallas_call(
        functools.partial(_concat_last_kernel, m=m),
        out_shape=jax.ShapeDtypeStruct((rows, m + n), h.dtype),
        grid_spec=pltpu.PrefetchScalarGridSpec(
            num_scalar_prefetch=0,
            grid=grid,
            in_specs=[
                pl.BlockSpec((tr, m), lambda i: (i, 0)),
                pl.BlockSpec((tr, n), lambda i: (i, 0)),
            ],
            out_specs=pl.BlockSpec((tr, m + n), lambda i: (i, 0)),
        ),
        compiler_params=pltpu.CompilerParams(
            dimension_semantics=("parallel",),
            vmem_limit_bytes=_vmem_limit_bytes(tr, m, n, h.dtype),
        ),
    )(h2, p2)

    return out.reshape(*lead_shape, m + n)


class ResidualConnectionDenseNet:
    """JAX/Pallas port of graphium's ResidualConnectionDenseNet (no weights)."""

    h_dim_increase_type = "cumulative"
    has_weights = False

    def __init__(self, skip_steps: int = 1):
        self.skip_steps = skip_steps

    def _bool_apply_skip_step(self, step_idx: int) -> bool:
        return self.skip_steps != 0 and step_idx % self.skip_steps == 0

    def forward(self, h, h_prev, step_idx: int):
        if self._bool_apply_skip_step(step_idx):
            if step_idx > 0:
                h = _concat_last_dim(h, h_prev)
            h_prev = h
        return h, h_prev

    __call__ = forward


if __name__ == "__main__":
    key = jax.random.PRNGKey(0)
    k1, k2, k3, k4, k5 = jax.random.split(key, 5)

    skip_steps = 1
    residual = ResidualConnectionDenseNet(skip_steps=skip_steps)

    # --- step 0: h_prev is None, h passes through, h_prev becomes h ---
    batch, seq, m = 2, 8, 32
    h0 = jax.random.normal(k1, (batch, seq, m), dtype=jnp.float32)
    h, h_prev = residual(h0, None, step_idx=0)
    assert h.shape == (batch, seq, m)
    assert h_prev.shape == (batch, seq, m)

    # --- step 2, small shapes (falls back to fused XLA concat by design) ---
    step_idx = 2
    n_small = ((step_idx // skip_steps) + 1) * m
    h_cur = jax.random.normal(k2, (batch, seq, m), dtype=jnp.float32)
    h_acc = jax.random.normal(k3, (batch, seq, n_small), dtype=jnp.float32)
    h_out, h_prev_out = residual(h_cur, h_acc, step_idx=step_idx)
    h_out = jax.block_until_ready(h_out)
    ref = jnp.concatenate([h_cur, h_acc], axis=-1)
    assert h_out.shape == (batch, seq, m + n_small)
    assert jnp.array_equal(h_out, ref), "small concat mismatch"
    assert jnp.array_equal(h_prev_out, ref), "h_prev should equal concatenated h"

    # --- step 2, Pallas path, 128-aligned split (dense two-store branch) ---
    M = 128
    N = ((step_idx // skip_steps) + 1) * M  # 384
    hL = jax.random.normal(k4, (4, 256, M), dtype=jnp.float32)
    pL = jax.random.normal(k5, (4, 256, N), dtype=jnp.float32)
    hL_out, pL_out = residual(hL, pL, step_idx=step_idx)
    hL_out = jax.block_until_ready(hL_out)
    refL = jnp.concatenate([hL, pL], axis=-1)
    assert hL_out.shape == (4, 256, M + N)
    assert jnp.array_equal(hL_out, refL), "aligned Pallas concat mismatch"
    assert jnp.array_equal(pL_out, refL)

    # --- Pallas path, unaligned split (single full-tile store branch) ---
    hu = jax.random.normal(jax.random.PRNGKey(3), (8, 128, 96), dtype=jnp.float32)
    pu = jax.random.normal(jax.random.PRNGKey(4), (8, 128, 224), dtype=jnp.float32)
    out_u = jax.block_until_ready(_concat_last_dim(hu, pu))
    assert jnp.array_equal(out_u, jnp.concatenate([hu, pu], axis=-1)), \
        "unaligned Pallas concat mismatch"

    # --- ragged rows (rows % 8 != 0): exercises cdiv grid + masked edge block ---
    hr = jax.random.normal(jax.random.PRNGKey(1), (3, 7, 32), dtype=jnp.float32)
    pr = jax.random.normal(jax.random.PRNGKey(2), (3, 7, 64), dtype=jnp.float32)
    out_r = jax.block_until_ready(_concat_last_dim(hr, pr, _force_pallas=True))
    assert jnp.array_equal(out_r, jnp.concatenate([hr, pr], axis=-1)), \
        "ragged concat mismatch"

    # --- bf16 (sublane-packed dtype, 16-row tile alignment) ---
    hb = hr.astype(jnp.bfloat16)
    pb = pr.astype(jnp.bfloat16)
    out_b = jax.block_until_ready(_concat_last_dim(hb, pb, _force_pallas=True))
    assert jnp.array_equal(out_b, jnp.concatenate([hb, pb], axis=-1)), \
        "bf16 concat mismatch"

    # --- skip-off step (skip_steps=2, odd step): pass-through ---
    residual2 = ResidualConnectionDenseNet(skip_steps=2)
    h_pt, h_prev_pt = residual2(h_cur, h_acc, step_idx=1)
    assert h_pt is h_cur and h_prev_pt is h_acc

    print("KERNEL_OK")
</pallas_src>

<mosaic_0001>
module attributes {stable_mosaic.version = 11 : i64} {
  func.func @_concat_last_kernel(%arg0: i32, %arg1: memref<128x128xf32, #tpu.memory_space<vmem>>, %arg2: memref<128x384xf32, #tpu.memory_space<vmem>>, %arg3: memref<128x512xf32, #tpu.memory_space<vmem>>) attributes {dimension_semantics = [#tpu.dimension_semantics<parallel>], iteration_bounds = array<i64: 8>, scalar_prefetch = 0 : i64, scratch_operands = 0 : i64, tpu.core_type = #tpu.core_type<tc>, window_params = [{transform_indices = @transform_0, window_bounds = array<i64: 128, 128>}, {transform_indices = @transform_1, window_bounds = array<i64: 128, 384>}, {transform_indices = @transform_2, window_bounds = array<i64: 128, 512>}]} {
    %c0 = arith.constant 0 : index
    %c0_0 = arith.constant 0 : index
    %0 = vector.load %arg1[%c0, %c0_0] : memref<128x128xf32, #tpu.memory_space<vmem>>, vector<128x128xf32>
    %c0_1 = arith.constant 0 : index
    %c0_2 = arith.constant 0 : index
    %1 = vector.load %arg3[%c0_1, %c0_2] : memref<128x512xf32, #tpu.memory_space<vmem>>, vector<128x128xf32>
    tpu.vector_store %arg3[%c0_1, %c0_2], %0 {strides = array<i32>} : memref<128x512xf32, #tpu.memory_space<vmem>>, vector<128x128xf32>,
    %c0_3 = arith.constant 0 : index
    %c0_4 = arith.constant 0 : index
    %2 = vector.load %arg2[%c0_3, %c0_4] : memref<128x384xf32, #tpu.memory_space<vmem>>, vector<128x384xf32>
    %c0_5 = arith.constant 0 : index
    %c128 = arith.constant 128 : index
    %3 = vector.load %arg3[%c0_5, %c128] : memref<128x512xf32, #tpu.memory_space<vmem>>, vector<128x384xf32>
    tpu.vector_store %arg3[%c0_5, %c128], %2 {strides = array<i32>} : memref<128x512xf32, #tpu.memory_space<vmem>>, vector<128x384xf32>,
    return
  }
  func.func @transform_0(%arg0: i32) -> (i32, i32) {
    %c0_i32 = arith.constant 0 : i32
    %c0_i32_0 = arith.constant 0 : i32
    return %arg0, %c0_i32 : i32, i32
  }
  func.func @transform_1(%arg0: i32) -> (i32, i32) {
    %c0_i32 = arith.constant 0 : i32
    %c0_i32_0 = arith.constant 0 : i32
    return %arg0, %c0_i32 : i32, i32
  }
  func.func @transform_2(%arg0: i32) -> (i32, i32) {
    %c0_i32 = arith.constant 0 : i32
    %c0_i32_0 = arith.constant 0 : i32
    return %arg0, %c0_i32 : i32, i32
  }
}

</mosaic_0001>

<bundles_post_ra>
// kernel: tpu_custom_call.1
= control target key start
LH: loop header
LB: loop body
LE: loop exit
PB: predicated region body
PF: predicated region fallthrough
CT: control target
= control target key end

     0   :  { %7 = vsyncpa [#allocation3], 0  ;;  %s1028_s0 = inlined_call_operand.hbm [shape: f32[1024,128], index: 0, kind: input, shape index: {}]   ;;  %s1029_s1 = inlined_call_operand.hbm [shape: f32[1024,384], index: 1, kind: input, shape index: {}]   ;;  %s1030_s2 = inlined_call_operand.hbm [shape: f32[1024,512], index: 2, kind: output, shape index: {}]  }
   0x1   :  { %9 = vsyncpa [#allocation3 + $0x1], 0 }
   0x2   :  { %10 = vsyncpa [#allocation6], 0 }
   0x3   :  { %12 = vsyncpa [#allocation6 + $0x1], 0 }
   0x4   :  { %13 = vsyncpa [#allocation4], 0 }
   0x5   :  { %15 = vsyncpa [#allocation4 + $0x1], 0  ;;  %s682_s9 = smov 0   ;;  %s684_s10 = smov 0  }
   0x6   :  { %s686_s11 = smov 0   ;;  %s688_s12 = smov 0  }
   0x7 LB: > { %s703_s13 = sadd.s32 4294967295, %s656_s12   ;;  %s445_s14 = sadd.s32 4294967294, %s656_s12   ;;  %s656_s12 = sphi %s688_s12, %s1045_s12   ;;  %s652_s11 = sphi %s686_s11, %s1044_s11   ;;  %s648_s10 = sphi %s684_s10, %s1043_s10   ;;  %s644_s9 = sphi %s682_s9, %s1042_s9  }
   0x8   : > { %s707_s15 = sadd.s32 1, %s656_s12   ;;  %s28_s16 = sadd.s32 1, %s652_s11 }
   0x9   : > { %s25_s17 = ssub.s32 %s656_s12, %s707_s15  ;;  %p35_p0 = scmp.ne.s32.totalorder %s652_s11, %s648_s10 }
   0xa   : > { %p26_p1 = scmp.eq.s32.totalorder %s25_s17, 0  ;;  %p36_p2 = scmp.eq.s32.totalorder %s656_s12, 0 }
   0xb   : > { %p41_p3 = scmp.ne.s32.totalorder %s648_s10, %s644_s9  ;;  %p42_p4 = scmp.eq.s32.totalorder %s703_s13, 0 }
   0xc   : > { %s719_s18 = scalar_select %p26_p1, %s652_s11, %s28_s16  }
   0xd   : > { %p721_p5 = por %p36_p2, %p35_p0  ;;  %p725_p6 = por %p42_p4, %p41_p3 }
   0xe   : > { %p91_p7 = scmp.eq.s32.totalorder %s703_s13, 7  ;;  %p97_p8 = scmp.eq.s32.totalorder %s445_s14, 7 }
   0xf   : > { %s1034_s20 = scalar_select %p725_p6, 1, 0 }
  0x10   : > { %p486_p9 = scmp.lt.s32.totalorder %s656_s12, 8  ;;  %p731_p10 = por %p91_p7, %p35_p0 }
  0x11   : > { %p735_p11 = por %p97_p8, %p41_p3  ;;  %s740_s23 = sand.u32 1, %s652_s11  }
  0x12   : > { %s1035_s21 = scalar_select %p731_p10, 1, 0 }
  0x13   : > { %s1036_s22 = scalar_select %p735_p11, 1, 0 }
  0x14   : > { %s463_s24 = sshll.u32 %s656_s12, 11  ;;  %s448_s25 = sshll.u32 %s740_s23, 7 }
  0x15   : > { %s747_s28 = scalar_lea.hbm %s1028_s0, %s463_s24  ;;  %s121_s29 = scalar_lea.vmem [#allocation2], %s448_s25 }
  0x16   : > { %s128_s30 = sshll.u32 %s121_s29, 4  ;;  %p751_p12 = pnand %p486_p9, %p721_p5  ;;  %s755_s30 = int_to_ptr.vmem [resolvable:$true] %s128_s30 }
  0x17   : > { %s118_s4 = scalar_lea.sflag [#allocation3], %s740_s23  ;;  %s526_s5 = scalar_lea.hbm %s747_s28, 2048 }
  0x18   : > { %p527_p13 = scmp.ne.s32.totalorder %s747_s28, %s526_s5  ;;  %p528_p0 = pneg %p751_p12 }
  0x19   : > { %s531_s8 = scalar_lea.hbm %s1028_s0, 16384  ;;  %p532_p3 = scmp.lt.u32.totalorder %s747_s28, %s1028_s0 }
  0x1a   : > { %p529_p1 = pnand %p528_p0, %p527_p13  ;;  %p533_p4 = scmp.lt.u32.totalorder %s531_s8, %s526_s5 }
  0x1b   : > { %p535_p7 = scmp.lt.u32.totalorder %s526_s5, %s747_s28 }
  0x1c   : > { %p530_p2 = pneg %p529_p1  ;;  %p534_p5 = por %p533_p4, %p532_p3 }
  0x1e   : > { %p536_p8 = por %p535_p7, %p534_p5 }
  0x20   : > { %p537_p9 = pnand %p536_p8, %p530_p2 }
  0x22   : > { %540 = shalt.err (!%p537_p9)
}
  0x23   : > { %s541_s17 = scalar_lea.vmem %s755_s30, 2048  ;;  %s658_s19 = smov [#allocation2]  }
  0x24   : > { %p542_p13 = scmp.ne.s32.totalorder %s755_s30, %s541_s17  ;;  %s546_s24 = sshll.u32 %s658_s19, 4  ;;  %s547_s24 = int_to_ptr.vmem [resolvable:$false] %s546_s24 }
  0x25   : > { %s548_s25 = scalar_lea.vmem %s547_s24, 4096  ;;  %p549_p10 = scmp.lt.s32.totalorder %s755_s30, %s547_s24 }
  0x26   : > { %p544_p1 = pnand %p542_p13, %p528_p0  ;;  %p550_p3 = scmp.lt.s32.totalorder %s548_s25, %s541_s17 }
  0x28   : > { %p545_p11 = pneg %p544_p1  ;;  %p551_p4 = por %p550_p3, %p549_p10 }
  0x2a   : > { %p552_p5 = pnand %p551_p4, %p545_p11 }
  0x2c   : > { %555 = shalt.err (!%p552_p5)
}
  0x2d   : > { %s659_s26 = smov 128   ;;  %s660_s27 = smov 8  }
  0x2e   : > { %478 = dma.hbm_to_vmem [thread:$0]  (!%p751_p12), %s747_s28, 2048, %s755_s30, %s118_s4, %s659_s26, %s659_s26, %s660_s27  }
  0x2f   : > { %p454_p2 = scmp.ge.s32.totalorder %s656_s12, 1  ;;  %p158_p7 = scmp.lt.s32.totalorder %s656_s12, 9 }
  0x30   : > { %s466_s29 = smul.u32 384, %s740_s23  ;;  %s139_s28 = scalar_lea.sflag [#allocation6], %s740_s23 }
  0x31   : > { %p788_p10 = pnand %p454_p2, %p158_p7  ;;  %s467_s6 = smul.u32 6144, %s656_s12 }
  0x32   : > { %s142_s16 = scalar_lea.vmem [#allocation5], %s466_s29  ;;  %s561_s24 = scalar_lea.hbm %s1029_s1, 49152 }
  0x33   : > { %s796_s14 = scalar_lea.hbm %s1029_s1, %s467_s6  ;;  %s150_s17 = sshll.u32 %s142_s16, 4  ;;  %s798_s17 = int_to_ptr.vmem [resolvable:$true] %s150_s17 }
  0x34   : > { %s556_s30 = scalar_lea.hbm %s796_s14, 6144  ;;  %p562_p13 = scmp.lt.u32.totalorder %s796_s14, %s1029_s1 }
  0x35   : > { %p557_p11 = scmp.ne.s32.totalorder %s796_s14, %s556_s30  ;;  %p563_p1 = scmp.lt.u32.totalorder %s561_s24, %s556_s30 }
  0x36   : > { %p565_p4 = scmp.lt.u32.totalorder %s556_s30, %s796_s14 }
  0x37   : > { %p559_p8 = pnand %p557_p11, %p528_p0  ;;  %p564_p3 = por %p563_p1, %p562_p13 }
  0x39   : > { %p560_p9 = pneg %p559_p8  ;;  %p566_p5 = por %p565_p4, %p564_p3 }
  0x3b   : > { %p567_p2 = pnand %p566_p5, %p560_p9 }
  0x3d   : > { %570 = shalt.err (!%p567_p2)
}
  0x3e   : > { %s571_s27 = scalar_lea.vmem %s798_s17, 6144  ;;  %s661_s29 = smov [#allocation5]  }
  0x3f   : > { %p572_p7 = scmp.ne.s32.totalorder %s798_s17, %s571_s27  ;;  %s576_s6 = sshll.u32 %s661_s29, 4  ;;  %s577_s6 = int_to_ptr.vmem [resolvable:$false] %s576_s6 }
  0x40   : > { %s578_s7 = scalar_lea.vmem %s577_s6, 12288  ;;  %p579_p6 = scmp.lt.s32.totalorder %s798_s17, %s577_s6 }
  0x41   : > { %p574_p11 = pnand %p572_p7, %p528_p0  ;;  %p580_p13 = scmp.lt.s32.totalorder %s578_s7, %s571_s27 }
  0x43   : > { %p575_p8 = pneg %p574_p11  ;;  %p581_p1 = por %p580_p13, %p579_p6 }
  0x45   : > { %p582_p3 = pnand %p581_p1, %p575_p8 }
  0x47   : > { %585 = shalt.err (!%p582_p3)
}
  0x48   : > { %s662_s8 = smov 384   ;;  %s663_s16 = smov 24  }
  0x49   : > { %481 = dma.hbm_to_vmem [thread:$0]  (!%p751_p12), %s796_s14, 6144, %s798_s17, %s139_s28, %s662_s8, %s662_s8, %s663_s16  }
  0x4a   : > { %162 = sbr.rel (%p788_p10) target bundleno = 134 (0x86), region = 28  ;;  %s829_s30 = sand.u32 (!%p788_p10), 1, %s648_s10  }
  0x4b   : > { %s455_s4 = sshll.u32 (!%p788_p10), %s829_s30, 7  ;;  %s165_s19 = scalar_lea.sflag (!%p788_p10), [#allocation3], %s829_s30 }
  0x4c   : > { %s833_s24 = scalar_lea.vmem (!%p788_p10), [#allocation2], %s455_s4  ;;  %p1039_p6 = scmp.ne.s32.totalorder (!%p788_p10), %s1034_s20, 0 }
  0x51   : > { %631 = dma.done.wait (%p1039_p6), %s165_s19, 2048  }
  0x52   : > { %633 = vsyncadd (%p1039_p6), %s165_s19, 4294965248  ;;  %s468_s23 = smul.u32 384, %s829_s30  ;;  %s174_s3 = scalar_lea.sflag [#allocation6], %s829_s30 }
  0x54   : > { %s841_s5 = scalar_lea.vmem [#allocation5], %s468_s23 }
  0x55   : > { %635 = dma.done.wait (%p1039_p6), %s174_s3, 6144  }
  0x56   : > { %637 = vsyncadd (%p1039_p6), %s174_s3, 4294961152  ;;  %s456_s14 = sshll.u32 %s829_s30, 9  ;;  %v206_v0 = vld [vmem:[%s833_s24] sm:$0xff]  ;;  %v207_v1 = vld [vmem:[%s833_s24 + $0x8] sm:$0xff]  ;;  %s465_s20 = sshll.u32 %s703_s13, 13 }
  0x57   : > { %v208_v2 = vld [vmem:[%s833_s24 + $0x10] sm:$0xff]  ;;  %s851_s17 = scalar_lea.vmem [#allocation7], %s456_s14  ;;  %v209_v3 = vld [vmem:[%s833_s24 + $0x18] sm:$0xff]  ;;  %v210_v4 = vld [vmem:[%s833_s24 + $0x20] sm:$0xff]  ;;  %s972_s26 = scalar_lea.hbm %s1030_s2, %s465_s20 }
  0x58   : > { %222 = vst [vmem:[%s851_s17] sm:$0xff] %v206_v0  ;;  %223 = vst [vmem:[%s851_s17 + $0x20] sm:$0xff] %v207_v1  ;;  %v211_v5 = vld [vmem:[%s833_s24 + $0x28] sm:$0xff]  ;;  %v212_v6 = vld [vmem:[%s833_s24 + $0x30] sm:$0xff]  ;;  %s349_s28 = sshll.u32 %s851_s17, 4  ;;  %s335_s27 = scalar_lea.sflag [#allocation4], %s829_s30  ;;  %s974_s28 = int_to_ptr.vmem [resolvable:$true] %s349_s28 }
  0x59   : > { %224 = vst [vmem:[%s851_s17 + $0x40] sm:$0xff] %v208_v2  ;;  %225 = vst [vmem:[%s851_s17 + $0x60] sm:$0xff] %v209_v3  ;;  %v213_v7 = vld [vmem:[%s833_s24 + $0x38] sm:$0xff]  ;;  %v214_v8 = vld [vmem:[%s833_s24 + $0x40] sm:$0xff]  ;;  %s586_s29 = scalar_lea.vmem %s974_s28, 8192  ;;  %p1040_p0 = scmp.ne.s32.totalorder %s1035_s21, 0 }
  0x5a   : > { %226 = vst [vmem:[%s851_s17 + $0x80] sm:$0xff] %v210_v4  ;;  %227 = vst [vmem:[%s851_s17 + $0xa0] sm:$0xff] %v211_v5  ;;  %v215_v9 = vld [vmem:[%s833_s24 + $0x48] sm:$0xff]  ;;  %v216_v10 = vld [vmem:[%s833_s24 + $0x50] sm:$0xff]  ;;  %p587_p12 = scmp.ne.s32.totalorder %s974_s28, %s586_s29  ;;  %s664_s6 = smov [#allocation7]  }
  0x5b   : > { %228 = vst [vmem:[%s851_s17 + $0xc0] sm:$0xff] %v212_v6  ;;  %229 = vst [vmem:[%s851_s17 + $0xe0] sm:$0xff] %v213_v7  ;;  %v217_v11 = vld [vmem:[%s833_s24 + $0x58] sm:$0xff]  ;;  %v218_v12 = vld [vmem:[%s833_s24 + $0x60] sm:$0xff]  ;;  %s590_s7 = sshll.u32 %s664_s6, 4  ;;  %s591_s7 = int_to_ptr.vmem [resolvable:$false] %s590_s7 }
  0x5c   : > { %230 = vst [vmem:[%s851_s17 + $0x100] sm:$0xff] %v214_v8  ;;  %231 = vst [vmem:[%s851_s17 + $0x120] sm:$0xff] %v215_v9  ;;  %v219_v13 = vld [vmem:[%s833_s24 + $0x68] sm:$0xff]  ;;  %v220_v14 = vld [vmem:[%s833_s24 + $0x70] sm:$0xff]  ;;  %p588_p10 = pnand %p587_p12, %p1040_p0  ;;  %s592_s8 = scalar_lea.vmem %s591_s7, 16384 }
  0x5d   : > { %232 = vst [vmem:[%s851_s17 + $0x140] sm:$0xff] %v216_v10  ;;  %233 = vst [vmem:[%s851_s17 + $0x160] sm:$0xff] %v217_v11  ;;  %v221_v15 = vld [vmem:[%s833_s24 + $0x78] sm:$0xff]  ;;  %v238_v16 = vld [vmem:[%s841_s5] sm:$0xff]  ;;  %p593_p4 = scmp.lt.s32.totalorder %s974_s28, %s591_s7  ;;  %p594_p5 = scmp.lt.s32.totalorder %s592_s8, %s586_s29 }
  0x5e   : > { %234 = vst [vmem:[%s851_s17 + $0x180] sm:$0xff] %v218_v12  ;;  %235 = vst [vmem:[%s851_s17 + $0x1a0] sm:$0xff] %v219_v13  ;;  %v239_v17 = vld [vmem:[%s841_s5 + $0x8] sm:$0xff]  ;;  %v240_v18 = vld [vmem:[%s841_s5 + $0x10] sm:$0xff]  ;;  %p589_p9 = pneg %p588_p10 }
  0x5f   : > { %236 = vst [vmem:[%s851_s17 + $0x1c0] sm:$0xff] %v220_v14  ;;  %237 = vst [vmem:[%s851_s17 + $0x1e0] sm:$0xff] %v221_v15  ;;  %v241_v19 = vld [vmem:[%s841_s5 + $0x18] sm:$0xff]  ;;  %v242_v20 = vld [vmem:[%s841_s5 + $0x20] sm:$0xff]  ;;  %p595_p2 = por %p594_p5, %p593_p4 }
  0x60   : > { %286 = vst [vmem:[%s851_s17 + $0x8] sm:$0xff] %v238_v16  ;;  %287 = vst [vmem:[%s851_s17 + $0x10] sm:$0xff] %v239_v17  ;;  %v243_v21 = vld [vmem:[%s841_s5 + $0x28] sm:$0xff]  ;;  %v244_v22 = vld [vmem:[%s841_s5 + $0x30] sm:$0xff] }
  0x61   : > { %288 = vst [vmem:[%s851_s17 + $0x18] sm:$0xff] %v240_v18  ;;  %289 = vst [vmem:[%s851_s17 + $0x28] sm:$0xff] %v241_v19  ;;  %v245_v23 = vld [vmem:[%s841_s5 + $0x38] sm:$0xff]  ;;  %v246_v24 = vld [vmem:[%s841_s5 + $0x40] sm:$0xff]  ;;  %p596_p7 = pnand %p595_p2, %p589_p9 }
  0x62   : > { %290 = vst [vmem:[%s851_s17 + $0x30] sm:$0xff] %v242_v20  ;;  %291 = vst [vmem:[%s851_s17 + $0x38] sm:$0xff] %v243_v21  ;;  %v247_v25 = vld [vmem:[%s841_s5 + $0x48] sm:$0xff]  ;;  %v248_v26 = vld [vmem:[%s841_s5 + $0x50] sm:$0xff] }
  0x63   : > { %292 = vst [vmem:[%s851_s17 + $0x48] sm:$0xff] %v244_v22  ;;  %293 = vst [vmem:[%s851_s17 + $0x50] sm:$0xff] %v245_v23  ;;  %v249_v27 = vld [vmem:[%s841_s5 + $0x58] sm:$0xff]  ;;  %v250_v28 = vld [vmem:[%s841_s5 + $0x60] sm:$0xff] }
  0x64   : > { %294 = vst [vmem:[%s851_s17 + $0x58] sm:$0xff] %v246_v24  ;;  %295 = vst [vmem:[%s851_s17 + $0x68] sm:$0xff] %v247_v25  ;;  %v251_v29 = vld [vmem:[%s841_s5 + $0x68] sm:$0xff]  ;;  %v252_v30 = vld [vmem:[%s841_s5 + $0x70] sm:$0xff] }
  0x65   : > { %296 = vst [vmem:[%s851_s17 + $0x70] sm:$0xff] %v248_v26  ;;  %297 = vst [vmem:[%s851_s17 + $0x78] sm:$0xff] %v249_v27  ;;  %v253_v31 = vld [vmem:[%s841_s5 + $0x78] sm:$0xff]  ;;  %v254_v32 = vld [vmem:[%s841_s5 + $0x80] sm:$0xff] }
  0x66   : > { %298 = vst [vmem:[%s851_s17 + $0x88] sm:$0xff] %v250_v28  ;;  %299 = vst [vmem:[%s851_s17 + $0x90] sm:$0xff] %v251_v29  ;;  %v255_v33 = vld [vmem:[%s841_s5 + $0x88] sm:$0xff]  ;;  %v256_v34 = vld [vmem:[%s841_s5 + $0x90] sm:$0xff] }
  0x67   : > { %300 = vst [vmem:[%s851_s17 + $0x98] sm:$0xff] %v252_v30  ;;  %301 = vst [vmem:[%s851_s17 + $0xa8] sm:$0xff] %v253_v31  ;;  %v257_v35 = vld [vmem:[%s841_s5 + $0x98] sm:$0xff]  ;;  %v258_v36 = vld [vmem:[%s841_s5 + $0xa0] sm:$0xff] }
  0x68   : > { %302 = vst [vmem:[%s851_s17 + $0xb0] sm:$0xff] %v254_v32  ;;  %303 = vst [vmem:[%s851_s17 + $0xb8] sm:$0xff] %v255_v33  ;;  %v259_v37 = vld [vmem:[%s841_s5 + $0xa8] sm:$0xff]  ;;  %v260_v38 = vld [vmem:[%s841_s5 + $0xb0] sm:$0xff] }
  0x69   : > { %304 = vst [vmem:[%s851_s17 + $0xc8] sm:$0xff] %v256_v34  ;;  %305 = vst [vmem:[%s851_s17 + $0xd0] sm:$0xff] %v257_v35  ;;  %v261_v39 = vld [vmem:[%s841_s5 + $0xb8] sm:$0xff]  ;;  %v262_v40 = vld [vmem:[%s841_s5 + $0xc0] sm:$0xff] }
  0x6a   : > { %306 = vst [vmem:[%s851_s17 + $0xd8] sm:$0xff] %v258_v36  ;;  %307 = vst [vmem:[%s851_s17 + $0xe8] sm:$0xff] %v259_v37  ;;  %v263_v41 = vld [vmem:[%s841_s5 + $0xc8] sm:$0xff]  ;;  %v264_v42 = vld [vmem:[%s841_s5 + $0xd0] sm:$0xff] }
  0x6b   : > { %308 = vst [vmem:[%s851_s17 + $0xf0] sm:$0xff] %v260_v38  ;;  %309 = vst [vmem:[%s851_s17 + $0xf8] sm:$0xff] %v261_v39  ;;  %v265_v43 = vld [vmem:[%s841_s5 + $0xd8] sm:$0xff]  ;;  %v266_v44 = vld [vmem:[%s841_s5 + $0xe0] sm:$0xff] }
  0x6c   : > { %310 = vst [vmem:[%s851_s17 + $0x108] sm:$0xff] %v262_v40  ;;  %311 = vst [vmem:[%s851_s17 + $0x110] sm:$0xff] %v263_v41  ;;  %v267_v45 = vld [vmem:[%s841_s5 + $0xe8] sm:$0xff]  ;;  %v268_v46 = vld [vmem:[%s841_s5 + $0xf0] sm:$0xff] }
  0x6d   : > { %312 = vst [vmem:[%s851_s17 + $0x118] sm:$0xff] %v264_v42  ;;  %313 = vst [vmem:[%s851_s17 + $0x128] sm:$0xff] %v265_v43  ;;  %v269_v47 = vld [vmem:[%s841_s5 + $0xf8] sm:$0xff]  ;;  %v270_v48 = vld [vmem:[%s841_s5 + $0x100] sm:$0xff] }
  0x6e   : > { %314 = vst [vmem:[%s851_s17 + $0x130] sm:$0xff] %v266_v44  ;;  %315 = vst [vmem:[%s851_s17 + $0x138] sm:$0xff] %v267_v45  ;;  %v271_v49 = vld [vmem:[%s841_s5 + $0x108] sm:$0xff]  ;;  %v272_v50 = vld [vmem:[%s841_s5 + $0x110] sm:$0xff] }
  0x6f   : > { %316 = vst [vmem:[%s851_s17 + $0x148] sm:$0xff] %v268_v46  ;;  %317 = vst [vmem:[%s851_s17 + $0x150] sm:$0xff] %v269_v47  ;;  %v273_v51 = vld [vmem:[%s841_s5 + $0x118] sm:$0xff]  ;;  %v274_v52 = vld [vmem:[%s841_s5 + $0x120] sm:$0xff] }
  0x70   : > { %318 = vst [vmem:[%s851_s17 + $0x158] sm:$0xff] %v270_v48  ;;  %319 = vst [vmem:[%s851_s17 + $0x168] sm:$0xff] %v271_v49  ;;  %v275_v53 = vld [vmem:[%s841_s5 + $0x128] sm:$0xff]  ;;  %v276_v54 = vld [vmem:[%s841_s5 + $0x130] sm:$0xff] }
  0x71   : > { %320 = vst [vmem:[%s851_s17 + $0x170] sm:$0xff] %v272_v50  ;;  %321 = vst [vmem:[%s851_s17 + $0x178] sm:$0xff] %v273_v51  ;;  %v277_v55 = vld [vmem:[%s841_s5 + $0x138] sm:$0xff]  ;;  %v278_v56 = vld [vmem:[%s841_s5 + $0x140] sm:$0xff] }
  0x72   : > { %322 = vst [vmem:[%s851_s17 + $0x188] sm:$0xff] %v274_v52  ;;  %323 = vst [vmem:[%s851_s17 + $0x190] sm:$0xff] %v275_v53  ;;  %v279_v57 = vld [vmem:[%s841_s5 + $0x148] sm:$0xff]  ;;  %v280_v58 = vld [vmem:[%s841_s5 + $0x150] sm:$0xff] }
  0x73   : > { %324 = vst [vmem:[%s851_s17 + $0x198] sm:$0xff] %v276_v54  ;;  %325 = vst [vmem:[%s851_s17 + $0x1a8] sm:$0xff] %v277_v55  ;;  %v281_v59 = vld [vmem:[%s841_s5 + $0x158] sm:$0xff]  ;;  %v282_v60 = vld [vmem:[%s841_s5 + $0x160] sm:$0xff] }
  0x74   : > { %326 = vst [vmem:[%s851_s17 + $0x1b0] sm:$0xff] %v278_v56  ;;  %327 = vst [vmem:[%s851_s17 + $0x1b8] sm:$0xff] %v279_v57  ;;  %v283_v61 = vld [vmem:[%s841_s5 + $0x168] sm:$0xff]  ;;  %v284_v62 = vld [vmem:[%s841_s5 + $0x170] sm:$0xff] }
  0x75   : > { %328 = vst [vmem:[%s851_s17 + $0x1c8] sm:$0xff] %v280_v58  ;;  %329 = vst [vmem:[%s851_s17 + $0x1d0] sm:$0xff] %v281_v59  ;;  %v285_v63 = vld [vmem:[%s841_s5 + $0x178] sm:$0xff] }
  0x76   : > { %330 = vst [vmem:[%s851_s17 + $0x1d8] sm:$0xff] %v282_v60  ;;  %331 = vst [vmem:[%s851_s17 + $0x1e8] sm:$0xff] %v283_v61 }
  0x77   : > { %332 = vst [vmem:[%s851_s17 + $0x1f0] sm:$0xff] %v284_v62  ;;  %333 = vst [vmem:[%s851_s17 + $0x1f8] sm:$0xff] %v285_v63 }
  0x78   : > { %599 = shalt.err (!%p596_p7)
}
  0x79   : > { %s600_s16 = scalar_lea.hbm %s972_s26, 8192  ;;  %s604_s24 = scalar_lea.hbm %s1030_s2, 65536 }
  0x7a   : > { %p601_p11 = scmp.ne.s32.totalorder %s972_s26, %s600_s16  ;;  %p605_p1 = scmp.lt.u32.totalorder %s972_s26, %s1030_s2 }
  0x7b   : > { %p606_p3 = scmp.lt.u32.totalorder %s604_s24, %s600_s16  ;;  %p608_p12 = scmp.lt.u32.totalorder %s600_s16, %s972_s26 }
  0x7c   : > { %p602_p8 = pnand %p601_p11, %p1040_p0 }
  0x7d   : > { %p607_p6 = por %p606_p3, %p605_p1 }
  0x7e   : > { %p603_p13 = pneg %p602_p8 }
  0x7f   : > { %p609_p10 = por %p608_p12, %p607_p6 }
  0x81   : > { %p610_p9 = pnand %p609_p10, %p603_p13 }
  0x83   : > { %613 = shalt.err (!%p610_p9)
}
  0x84   : > { %s665_s5 = smov 512   ;;  %s666_s14 = smov 32  }
  0x85   : > { %473 = dma.vmem_to_hbm [thread:$0]  (%p1040_p0), %s974_s28, 8192, %s972_s26, %s335_s27, %s665_s5, %s665_s5, %s666_s14  }
  0x86 PF: > { %p487_p4 = scmp.ge.s32.totalorder %s656_s12, 2  ;;  %s364_s17 = sand.u32 1, %s644_s9  }
  0x87   : > { %p1041_p5 = scmp.ne.s32.totalorder %s1036_s22, 0  ;;  %s365_s20 = scalar_lea.sflag [#allocation4], %s364_s17 }
  0x89   : > { %p483_p2 = pnand %p487_p4, %p1041_p5 }
  0x8b   : > { %639 = dma.done.wait (!%p483_p2), %s365_s20, 8192  }
  0x8c   : > { %641 = vsyncadd (!%p483_p2), %s365_s20, 4294959104  ;;  %p18_p7 = scmp.ge.s32.totalorder %s707_s15, 10   ;;  %s1042_s9 = smov %s648_s10 }
  0x8d   : > { %s1043_s10 = smov %s652_s11  ;;  %s1044_s11 = smov %s719_s18 }
  0x8e   : > { %s1045_s12 = smov %s707_s15  ;;  %20 = sbr.rel (!%p18_p7) target bundleno = 7 (0x7), region = 86 }
  0x95   :  { %370 = vsyncpa [#allocation3], 1 }
  0x96   :  { %372 = vsyncpa [#allocation3 + $0x1], 1 }
  0x97   :  { %373 = vsyncpa [#allocation6], 1 }
  0x98   :  { %375 = vsyncpa [#allocation6 + $0x1], 1 }
  0x99   :  { %376 = vsyncpa [#allocation4], 1 }
  0x9a   :  { %378 = vsyncpa [#allocation4 + $0x1], 1 }

</bundles_post_ra>
